<compile_context>
chip_gen: v5e
topology: v5e:2x2
jax: 0.10.0
libtpu: 0.0.40
codegen_flags: <defaults>
</compile_context>

<pallas_src>
import jax
import jax.numpy as jnp
from jax.experimental import pallas as pl
from jax.experimental.pallas import tpu as pltpu


K_RAW = 28 * 28      # 784 contraction dim (no padding; full-extent block)
H_DIM = 128          # hidden width (lane-aligned)
N_RAW = 10           # logits
N_PAD = 128          # lane-dense output width (unmasked 128-wide stores)
TM_MAX = 1024        # max batch tile (multiple of 8; ~7 MiB VMEM w/ dbl-buffer)


def _round_up(x, m):
    return (x + m - 1) // m * m


def _cdiv(a, b):
    return (a + b - 1) // b


def _choose_tm(batch):
    """Batch tile: multiple of 8, <= TM_MAX, and >= 2 grid steps for batches
    of at least 16 rows so both v7x TensorCores get work.  Derived from B so
    padding waste per step stays < 8 rows (no B_pad overshoot)."""
    b8 = _round_up(batch, 8)
    n_steps = _cdiv(b8, TM_MAX)
    if b8 >= 16:
        n_steps = max(n_steps, 2)
    return _round_up(_cdiv(b8, n_steps), 8)


def mlp_kernel(x_ref, w1_ref, b1_ref, w2_ref, b2_ref, o_ref):
    """One (TM, 784) f32 batch tile -> (TM, 128) bf16 padded-logits tile.

    x_ref : (TM, 784) f32        w1_ref: (784, 128) bf16    b1_ref: (1, 128) f32
    w2_ref: (128, 128) bf16      b2_ref: (1, 128)  f32      o_ref : (TM, 128) bf16
    """
    # fc1: cast the streamed f32 tile to bf16 at the MXU, accumulate in f32.
    h = jnp.dot(x_ref[...].astype(jnp.bfloat16), w1_ref[...],
                preferred_element_type=jnp.float32)
    h = jnp.maximum(h + b1_ref[...], 0.0)           # f32 bias + ReLU on the VPU
    # fc2: bf16 MXU inputs, f32 accumulation, lane-dense bf16 store.
    y = jnp.dot(h.astype(jnp.bfloat16), w2_ref[...],
                preferred_element_type=jnp.float32)
    o_ref[...] = (y + b2_ref[...]).astype(o_ref.dtype)


@jax.jit
def simple_nn_forward(x_nchw, w1, b1, w2, b2):
    """x_nchw: (B, 1, 28, 28) float32.  Weights stored as (in, out) — i.e.
    transposed relative to torch nn.Linear.weight.  Returns (B, 10) f32 logits."""
    x2d = x_nchw.reshape(-1, K_RAW)                 # same as torch .view(-1, 784)
    B = x2d.shape[0]
    TM = _choose_tm(B)
    grid = (pl.cdiv(B, TM),)                        # ragged last tile is masked

    # Tiny VMEM-resident operands, padded/cast once; the big x stream is passed
    # through untouched (no HBM round trip).
    w1_bf = w1.astype(jnp.bfloat16)
    w2_p = jnp.zeros((H_DIM, N_PAD), jnp.bfloat16).at[:, :N_RAW].set(
        w2.astype(jnp.bfloat16))
    b1_2d = b1.reshape(1, H_DIM).astype(jnp.float32)
    b2_p = jnp.zeros((1, N_PAD), jnp.float32).at[:, :N_RAW].set(
        b2.reshape(1, N_RAW).astype(jnp.float32))

    flops = 2 * B * (K_RAW * H_DIM + H_DIM * N_PAD)
    bytes_accessed = (B * K_RAW * 4                   # x read (f32)
                      + K_RAW * H_DIM * 2 + H_DIM * N_PAD * 2   # weights (bf16)
                      + (H_DIM + N_PAD) * 4           # biases (f32)
                      + B * N_PAD * 2)                # output write (bf16)

    out = pl.pallas_call(
        mlp_kernel,
        out_shape=jax.ShapeDtypeStruct((B, N_PAD), jnp.bfloat16),
        grid=grid,
        in_specs=[
            pl.BlockSpec((TM, K_RAW), lambda i: (i, 0)),      # streamed input
            pl.BlockSpec((K_RAW, H_DIM), lambda i: (0, 0)),   # resident weights
            pl.BlockSpec((1, H_DIM), lambda i: (0, 0)),
            pl.BlockSpec((H_DIM, N_PAD), lambda i: (0, 0)),
            pl.BlockSpec((1, N_PAD), lambda i: (0, 0)),
        ],
        out_specs=pl.BlockSpec((TM, N_PAD), lambda i: (i, 0)),
        compiler_params=pltpu.CompilerParams(
            dimension_semantics=("parallel",)),
        cost_estimate=pl.CostEstimate(
            flops=flops, transcendentals=0, bytes_accessed=bytes_accessed),
    )(x2d, w1_bf, b1_2d, w2_p, b2_p)

    return out[:, :N_RAW].astype(jnp.float32)


def init_params(key):
    """Deterministic init matching nn.Linear shapes, stored as (in, out)."""
    k1, k2, k3, k4 = jax.random.split(key, 4)
    s1 = 1.0 / jnp.sqrt(float(K_RAW))
    s2 = 1.0 / jnp.sqrt(float(H_DIM))
    w1 = jax.random.uniform(k1, (K_RAW, H_DIM), jnp.float32, -s1, s1)
    b1 = jax.random.uniform(k2, (H_DIM,), jnp.float32, -s1, s1)
    w2 = jax.random.uniform(k3, (H_DIM, N_RAW), jnp.float32, -s2, s2)
    b2 = jax.random.uniform(k4, (N_RAW,), jnp.float32, -s2, s2)
    return w1, b1, w2, b2


if __name__ == "__main__":
    key = jax.random.PRNGKey(0)
    kx, kp = jax.random.split(key)
    # Small MNIST-like batch: (B=2, C=1, H=28, W=28), NCHW like PyTorch.
    x = jax.random.normal(kx, (2, 1, 28, 28), jnp.float32)
    w1, b1, w2, b2 = init_params(kp)

    out = simple_nn_forward(x, w1, b1, w2, b2)
    out = jax.block_until_ready(out)

    # Reference in plain JAX (f32 math). Kernel uses bf16 matmul inputs with
    # f32 accumulation and a bf16 logits store, so allow a small tolerance.
    x2d = x.reshape(2, K_RAW)
    ref = jnp.maximum(x2d @ w1 + b1, 0.0) @ w2 + b2
    assert out.shape == (2, N_RAW)
    assert jnp.allclose(out, ref, atol=3e-2, rtol=3e-2), (
        f"max abs err = {jnp.max(jnp.abs(out - ref))}")

    print("KERNEL_OK")
</pallas_src>

<mosaic_0001>
module attributes {stable_mosaic.version = 11 : i64} {
  func.func @mlp_kernel(%arg0: i32, %arg1: memref<8x784xf32, #tpu.memory_space<vmem>>, %arg2: memref<784x128xbf16, #tpu.memory_space<vmem>>, %arg3: memref<1x128xf32, #tpu.memory_space<vmem>>, %arg4: memref<128x128xbf16, #tpu.memory_space<vmem>>, %arg5: memref<1x128xf32, #tpu.memory_space<vmem>>, %arg6: memref<8x128xbf16, #tpu.memory_space<vmem>>) attributes {dimension_semantics = [#tpu.dimension_semantics<parallel>], iteration_bounds = array<i64: 1>, scalar_prefetch = 0 : i64, scratch_operands = 0 : i64, tpu.core_type = #tpu.core_type<tc>, window_params = [{transform_indices = @transform_0, window_bounds = array<i64: 8, 784>}, {pipeline_mode = #tpu.pipeline_mode<synchronous>, transform_indices = @transform_1, window_bounds = array<i64: 784, 128>}, {pipeline_mode = #tpu.pipeline_mode<synchronous>, transform_indices = @transform_2, window_bounds = array<i64: 1, 128>}, {pipeline_mode = #tpu.pipeline_mode<synchronous>, transform_indices = @transform_3, window_bounds = array<i64: 128, 128>}, {pipeline_mode = #tpu.pipeline_mode<synchronous>, transform_indices = @transform_4, window_bounds = array<i64: 1, 128>}, {transform_indices = @transform_5, window_bounds = array<i64: 8, 128>}]} {
    %c0 = arith.constant 0 : index
    %c0_0 = arith.constant 0 : index
    %0 = vector.load %arg1[%c0, %c0_0] : memref<8x784xf32, #tpu.memory_space<vmem>>, vector<8x784xf32>
    %1 = arith.truncf %0 : vector<8x784xf32> to vector<8x784xbf16>
    %c0_1 = arith.constant 0 : index
    %c0_2 = arith.constant 0 : index
    %2 = vector.load %arg2[%c0_1, %c0_2] : memref<784x128xbf16, #tpu.memory_space<vmem>>, vector<784x128xbf16>
    %cst = arith.constant dense<0.000000e+00> : vector<8x128xf32>
    %3 = tpu.matmul %1, %2, %cst {dimension_numbers = #tpu.dot_dimension_numbers<[1], [0], [0], [1], [0, 0, 1, 1], [], []>} : vector<8x784xbf16>, vector<784x128xbf16>, vector<8x128xf32> -> vector<8x128xf32>
    %c0_3 = arith.constant 0 : index
    %c0_4 = arith.constant 0 : index
    %4 = vector.load %arg3[%c0_3, %c0_4] : memref<1x128xf32, #tpu.memory_space<vmem>>, vector<1x128xf32>
    %5 = vector.broadcast %4 : vector<1x128xf32> to vector<8x128xf32>
    %6 = arith.addf %3, %5 : vector<8x128xf32>
    %cst_5 = arith.constant 0.000000e+00 : f32
    %7 = vector.broadcast %cst_5 : f32 to vector<8x128xf32>
    %8 = arith.maximumf %6, %7 : vector<8x128xf32>
    %9 = arith.truncf %8 : vector<8x128xf32> to vector<8x128xbf16>
    %c0_6 = arith.constant 0 : index
    %c0_7 = arith.constant 0 : index
    %10 = vector.load %arg4[%c0_6, %c0_7] : memref<128x128xbf16, #tpu.memory_space<vmem>>, vector<128x128xbf16>
    %cst_8 = arith.constant dense<0.000000e+00> : vector<8x128xf32>
    %11 = tpu.matmul %9, %10, %cst_8 {dimension_numbers = #tpu.dot_dimension_numbers<[1], [0], [0], [1], [0, 0, 1, 1], [], []>} : vector<8x128xbf16>, vector<128x128xbf16>, vector<8x128xf32> -> vector<8x128xf32>
    %c0_9 = arith.constant 0 : index
    %c0_10 = arith.constant 0 : index
    %12 = vector.load %arg5[%c0_9, %c0_10] : memref<1x128xf32, #tpu.memory_space<vmem>>, vector<1x128xf32>
    %13 = vector.broadcast %12 : vector<1x128xf32> to vector<8x128xf32>
    %14 = arith.addf %11, %13 : vector<8x128xf32>
    %15 = arith.truncf %14 : vector<8x128xf32> to vector<8x128xbf16>
    %c0_11 = arith.constant 0 : index
    %c0_12 = arith.constant 0 : index
    %16 = vector.load %arg6[%c0_11, %c0_12] : memref<8x128xbf16, #tpu.memory_space<vmem>>, vector<8x128xbf16>
    tpu.vector_store %arg6[%c0_11, %c0_12], %15 {strides = array<i32>} : memref<8x128xbf16, #tpu.memory_space<vmem>>, vector<8x128xbf16>,
    return
  }
  func.func @transform_0(%arg0: i32) -> (i32, i32) {
    %c0_i32 = arith.constant 0 : i32
    %c0_i32_0 = arith.constant 0 : i32
    return %arg0, %c0_i32 : i32, i32
  }
  func.func @transform_1(%arg0: i32) -> (i32, i32) {
    %c0_i32 = arith.constant 0 : i32
    %c0_i32_0 = arith.constant 0 : i32
    %c0_i32_1 = arith.constant 0 : i32
    return %c0_i32, %c0_i32_0 : i32, i32
  }
  func.func @transform_2(%arg0: i32) -> (i32, i32) {
    %c0_i32 = arith.constant 0 : i32
    %c0_i32_0 = arith.constant 0 : i32
    %c0_i32_1 = arith.constant 0 : i32
    return %c0_i32, %c0_i32_0 : i32, i32
  }
  func.func @transform_3(%arg0: i32) -> (i32, i32) {
    %c0_i32 = arith.constant 0 : i32
    %c0_i32_0 = arith.constant 0 : i32
    %c0_i32_1 = arith.constant 0 : i32
    return %c0_i32, %c0_i32_0 : i32, i32
  }
  func.func @transform_4(%arg0: i32) -> (i32, i32) {
    %c0_i32 = arith.constant 0 : i32
    %c0_i32_0 = arith.constant 0 : i32
    %c0_i32_1 = arith.constant 0 : i32
    return %c0_i32, %c0_i32_0 : i32, i32
  }
  func.func @transform_5(%arg0: i32) -> (i32, i32) {
    %c0_i32 = arith.constant 0 : i32
    %c0_i32_0 = arith.constant 0 : i32
    return %arg0, %c0_i32 : i32, i32
  }
}

</mosaic_0001>

<bundles_post_ra>
// kernel: simple_nn_forward.1
= control target key start
LH: loop header
LB: loop body
LE: loop exit
PB: predicated region body
PF: predicated region fallthrough
CT: control target
= control target key end

     0   :  { %vm469_vm0 = vcmask 130048   ;;  %vm650_vm1 = vcmask 1040384   ;;  %s1237_s0 = inlined_call_operand.vmem [shape: f32[2,784], index: 0, kind: input, shape index: {}]   ;;  %s1238_s1 = inlined_call_operand.vmem [shape: bf16[784,128], index: 1, kind: input, shape index: {}]   ;;  %s1239_s2 = inlined_call_operand.vmem [shape: f32[1,128], index: 2, kind: input, shape index: {}]   ;;  %s1240_s3 = inlined_call_operand.vmem [shape: bf16[128,128], index: 3, kind: input, shape index: {}]   ;;  %s1241_s4 = inlined_call_operand.vmem [shape: f32[1,128], index: 4, kind: input, shape index: {}]   ;;  %s1242_s5 = inlined_call_operand.vmem [shape: bf16[2,128], index: 5, kind: output, shape index: {}]  }
   0x1   :  { %v951_v0 = vld [vmem:[%s1238_s1 + $0x38] sm:$0xff]  ;;  %v950_v3 = vld [vmem:[%s1238_s1 + $0x30] sm:$0xff]  ;;  %v949_v8 = vld [vmem:[%s1238_s1 + $0x28] sm:$0xff] }
   0x2   :  { %v959_v1 = vld [vmem:[%s1238_s1 + $0x78] sm:$0xff]  ;;  %473 = vmatpush.bf16.msra.mxu0 %v951_v0  ;;  %v958_v4 = vld [vmem:[%s1238_s1 + $0x70] sm:$0xff]  ;;  %v957_v9 = vld [vmem:[%s1238_s1 + $0x68] sm:$0xff] }
   0x3   :  { %v967_v2 = vld [vmem:[%s1238_s1 + $0xb8] sm:$0xff]  ;;  %486 = vmatpush.bf16.msra.mxu1 %v959_v1  ;;  %v966_v5 = vld [vmem:[%s1238_s1 + $0xb0] sm:$0xff]  ;;  %v965_v10 = vld [vmem:[%s1238_s1 + $0xa8] sm:$0xff] }
   0x4   :  { %499 = vmatpush.bf16.msra.mxu2 %v967_v2  ;;  %v975_v6 = vld [vmem:[%s1238_s1 + $0xf8] sm:$0xff]  ;;  %v974_v7 = vld [vmem:[%s1238_s1 + $0xf0] sm:$0xff]  ;;  %v973_v11 = vld [vmem:[%s1238_s1 + $0xe8] sm:$0xff] }
   0x5   :  { %512 = vmatpush.bf16.msra.mxu3 %v975_v6  ;;  %v948_v12 = vld [vmem:[%s1238_s1 + $0x20] sm:$0xff]  ;;  %v23_v16 = vld [vmem:[%s1237_s0 + $0xe] sm:$0xff]  ;;  %v947_v20 = vld [vmem:[%s1238_s1 + $0x18] sm:$0xff] }
   0x6   :  { %474 = vmatpush.bf16.msra.mxu0 %v950_v3  ;;  %v956_v13 = vld [vmem:[%s1238_s1 + $0x60] sm:$0xff]  ;;  %v27_v18 = vld [vmem:[%s1237_s0 + $0x2a] sm:$0xff]  ;;  %39 = vst [vmem:[#allocation1 + $0x1] ss:$4 sm:$0xff] %v23_v16  ;;  %v955_v21 = vld [vmem:[%s1238_s1 + $0x58] sm:$0xff] }
   0x7   :  { %487 = vmatpush.bf16.msra.mxu1 %v958_v4  ;;  %v964_v14 = vld [vmem:[%s1238_s1 + $0xa0] sm:$0xff]  ;;  %v963_v22 = vld [vmem:[%s1238_s1 + $0x98] sm:$0xff]  ;;  %43 = vst [vmem:[#allocation1 + $0x3] ss:$4 sm:$0xff] %v27_v18  ;;  %v946_v23 = vld [vmem:[%s1238_s1 + $0x10] sm:$0xff] }
   0x8   :  { %500 = vmatpush.bf16.msra.mxu2 %v966_v5  ;;  %v21_v15 = vld [vmem:[%s1237_s0] sm:$0xff]  ;;  %v22_v24 = vld [vmem:[%s1237_s0 + $0x8] sm:$0x3f]  ;;  %v24_v25 = vld [vmem:[%s1237_s0 + $0x16] sm:$0x3f] }
   0x9   :  { %513 = vmatpush.bf16.msra.mxu3 %v974_v7  ;;  %v25_v17 = vld [vmem:[%s1237_s0 + $0x1c] sm:$0xff]  ;;  %37 = vst [vmem:[#allocation1] ss:$4 sm:$0xff] %v21_v15  ;;  %v26_v26 = vld [vmem:[%s1237_s0 + $0x24] sm:$0x3f]  ;;  %v954_v27 = vld [vmem:[%s1238_s1 + $0x50] sm:$0xff] }
   0xa   :  { %475 = vmatpush.bf16.msra.mxu0 %v949_v8  ;;  %v972_v19 = vld [vmem:[%s1238_s1 + $0xe0] sm:$0xff]  ;;  %41 = vst [vmem:[#allocation1 + $0x2] ss:$4 sm:$0xff] %v25_v17  ;;  %v971_v28 = vld [vmem:[%s1238_s1 + $0xd8] sm:$0xff]  ;;  %v28_v29 = vld [vmem:[%s1237_s0 + $0x32] sm:$0x3f] }
   0xb   :  { %488 = vmatpush.bf16.msra.mxu1 %v957_v9  ;;  %45 = vst [vmem:[#allocation1 + $0x20] ss:$4 sm:$0xff] %v22_v24  ;;  %v962_v30 = vld [vmem:[%s1238_s1 + $0x90] sm:$0xff]  ;;  %v945_v32 = vld [vmem:[%s1238_s1 + $0x8] sm:$0xff]  ;;  %v944_v35 = vld [vmem:[%s1238_s1] sm:$0xff] }
   0xc   :  { %501 = vmatpush.bf16.msra.mxu2 %v965_v10  ;;  %47 = vst [vmem:[#allocation1 + $0x21] ss:$4 sm:$0xff] %v24_v25  ;;  %v970_v31 = vld [vmem:[%s1238_s1 + $0xd0] sm:$0xff]  ;;  %v953_v33 = vld [vmem:[%s1238_s1 + $0x48] sm:$0xff]  ;;  %v952_v36 = vld [vmem:[%s1238_s1 + $0x40] sm:$0xff] }
   0xd   :  { %514 = vmatpush.bf16.msra.mxu3 %v973_v11  ;;  %49 = vst [vmem:[#allocation1 + $0x22] ss:$4 sm:$0xff] %v26_v26  ;;  %v961_v34 = vld [vmem:[%s1238_s1 + $0x88] sm:$0xff]  ;;  %v983_v40 = vld [vmem:[%s1238_s1 + $0x138] sm:$0xff]  ;;  %v960_v42 = vld [vmem:[%s1238_s1 + $0x80] sm:$0xff] }
   0xe   :  { %476 = vmatpush.bf16.msra.mxu0 %v948_v12  ;;  %51 = vst [vmem:[#allocation1 + $0x23] ss:$4 sm:$0xff] %v28_v29  ;;  %v969_v37 = vld [vmem:[%s1238_s1 + $0xc8] sm:$0xff]  ;;  %v991_v41 = vld [vmem:[%s1238_s1 + $0x178] sm:$0xff]  ;;  %v968_v46 = vld [vmem:[%s1238_s1 + $0xc0] sm:$0xff] }
   0xf   :  { %489 = vmatpush.bf16.msra.mxu1 %v956_v13  ;;  %v992_v47 = vld [vmem:[%s1238_s1 + $0x180] sm:$0xff]  ;;  %v982_v49 = vld [vmem:[%s1238_s1 + $0x130] sm:$0xff]  ;;  %v981_v53 = vld [vmem:[%s1238_s1 + $0x128] sm:$0xff] }
  0x10   :  { %502 = vmatpush.bf16.msra.mxu2 %v964_v14  ;;  %v990_v50 = vld [vmem:[%s1238_s1 + $0x170] sm:$0xff]  ;;  %v989_v54 = vld [vmem:[%s1238_s1 + $0x168] sm:$0xff]  ;;  %v980_v55 = vld [vmem:[%s1238_s1 + $0x120] sm:$0xff] }
  0x11   :  { %515 = vmatpush.bf16.msra.mxu3 %v972_v19  ;;  %v52_v38 = vld.sshfl [vmem:[#allocation1] sm:$0xff pattern:$0x73625140]  ;;  %v53_v39 = vld.sshfl [vmem:[#allocation1 + $0x8] sm:$0xff pattern:$0x73625140] }
  0x12   :  { %477 = vmatpush.bf16.msra.mxu0 %v947_v20  ;;  %v54_v43 = vld.sshfl [vmem:[#allocation1 + $0x10] sm:$0xff pattern:$0x73625140]  ;;  %v66_v44 = vpack.c.bf16 %v52_v38, %v52_v38  ;;  %v67_v45 = vpack.c.bf16 %v53_v39, %v53_v39  ;;  %v55_v48 = vld.sshfl [vmem:[#allocation1 + $0x18] sm:$0xff pattern:$0x73625140] }
  0x13   :  { %490 = vmatpush.bf16.msra.mxu1 %v955_v21  ;;  %v68_v51 = vpack.c.bf16 %v54_v43, %v54_v43  ;;  %v69_v52 = vpack.c.bf16 %v55_v48, %v55_v48  ;;  %v988_v56 = vld [vmem:[%s1238_s1 + $0x160] sm:$0xff]  ;;  %v979_v57 = vld [vmem:[%s1238_s1 + $0x118] sm:$0xff]  ;;  %v978_v60 = vld [vmem:[%s1238_s1 + $0x110] sm:$0xff] }
  0x14   :  { %503 = vmatpush.bf16.msra.mxu2 %v963_v22  ;;  %v987_v58 = vld [vmem:[%s1238_s1 + $0x158] sm:$0xff]  ;;  %v986_v61 = vld [vmem:[%s1238_s1 + $0x150] sm:$0xff]  ;;  %v977_v63 = vld [vmem:[%s1238_s1 + $0x108] sm:$0xff] }
  0x15   :  { %516 = vmatpush.bf16.msra.mxu3 %v971_v28  ;;  %v58_v59 = vld.sshfl [vmem:[#allocation1 + $0x30] sm:$0xff pattern:$0x73625140]  ;;  %v985_v0 = vld [vmem:[%s1238_s1 + $0x148] sm:$0xff]  ;;  %v976_v1 = vld [vmem:[%s1238_s1 + $0x100] sm:$0xff] }
  0x16   :  { %478 = vmatpush.bf16.msra.mxu0 %v946_v23  ;;  %v72_v62 = vpack.c.bf16 %v58_v59, %v58_v59  ;;  %v984_v2 = vld [vmem:[%s1238_s1 + $0x140] sm:$0xff]  ;;  %v57_v4 = vld.sshfl [vmem:[#allocation1 + $0x28] sm:$0xff pattern:$0x73625140]  ;;  %v1000_v7 = vld [vmem:[%s1240_s3 + $0x38] sm:$0xff] }
  0x17   :  { %491 = vmatpush.bf16.msra.mxu1 %v954_v27  ;;  %v56_v3 = vld.sshfl [vmem:[#allocation1 + $0x20] sm:$0xff pattern:$0x73625140]  ;;  %v71_v6 = vpack.c.bf16 %v57_v4, %v57_v4  ;;  %v999_v8 = vld [vmem:[%s1240_s3 + $0x30] sm:$0xff]  ;;  %v998_v9 = vld [vmem:[%s1240_s3 + $0x28] sm:$0xff] }
  0x18   :  { %504 = vmatpush.bf16.msra.mxu2 %v962_v30  ;;  %v70_v5 = vpack.c.bf16 %v56_v3, %v56_v3  ;;  %v997_v10 = vld [vmem:[%s1240_s3 + $0x20] sm:$0xff]  ;;  %v996_v11 = vld [vmem:[%s1240_s3 + $0x18] sm:$0xff]  ;;  %v995_v12 = vld [vmem:[%s1240_s3 + $0x10] sm:$0xff] }
  0x19   :  { %517 = vmatpush.bf16.msra.mxu3 %v970_v31  ;;  %v994_v13 = vld [vmem:[%s1240_s3 + $0x8] sm:$0xff]  ;;  %v993_v16 = vld [vmem:[%s1240_s3] sm:$0xff] }
  0x1a   :  { %479 = vmatpush.bf16.msra.mxu0 %v945_v32  ;;  %v1001_v21 = vld [vmem:[%s1239_s2] ss:$0 sm:$0xff] }
  0x1b   :  { %492 = vmatpush.bf16.msra.mxu1 %v953_v33  ;;  %v1002_v39 = vld [vmem:[%s1241_s4] ss:$0 sm:$0xff] }
  0x1c   :  { %505 = vmatpush.bf16.msra.mxu2 %v961_v34 }
  0x1d   :  { %518 = vmatpush.bf16.msra.mxu3 %v969_v37 }
  0x1e   :  { %480 = vmatpush.bf16.msra.mxu0 %v944_v35 }
  0x1f   :  { %493 = vmatpush.bf16.msra.mxu1 %v952_v36 }
  0x20   :  { %506 = vmatpush.bf16.msra.mxu2 %v960_v42 }
  0x21   :  { %481 = vmatmul.bf16.vlgmr.msra.gmra.mxu0 %v66_v44  ;;  %519 = vmatpush.bf16.msra.mxu3 %v968_v46 }
  0x22   :  { %525 = vmatpush.bf16.msrb.mxu0 %v983_v40  ;;  %494 = vmatmul.bf16.vlgmr.msra.gmra.mxu1 %v67_v45 }
  0x23   :  { %538 = vmatpush.bf16.msrb.mxu1 %v991_v41  ;;  %507 = vmatmul.bf16.vlgmr.msra.gmra.mxu2 %v68_v51 }
  0x24   :  { %558 = vmatpush.bf16.msrb.mxu2 %v992_v47  ;;  %520 = vmatmul.bf16.vlgmr.msra.gmra.mxu3 %v69_v52 }
  0x25   :  { %634 = vmatpush.bf16.msrb.mxu3 %v1000_v7 }
  0x26   :  { %526 = vmatpush.bf16.msrb.mxu0 %v982_v49 }
  0x27   :  { %539 = vmatpush.bf16.msrb.mxu1 %v990_v50 }
  0x29   :  { %635 = vmatpush.bf16.msrb.mxu3 %v999_v8 }
  0x2a   :  { %527 = vmatpush.bf16.msrb.mxu0 %v981_v53 }
  0x2b   :  { %540 = vmatpush.bf16.msrb.mxu1 %v989_v54 }
  0x2d   :  { %636 = vmatpush.bf16.msrb.mxu3 %v998_v9 }
  0x2e   :  { %528 = vmatpush.bf16.msrb.mxu0 %v980_v55 }
  0x2f   :  { %541 = vmatpush.bf16.msrb.mxu1 %v988_v56 }
  0x31   :  { %637 = vmatpush.bf16.msrb.mxu3 %v997_v10 }
  0x32   :  { %529 = vmatpush.bf16.msrb.mxu0 %v979_v57 }
  0x33   :  { %542 = vmatpush.bf16.msrb.mxu1 %v987_v58  ;;  %911 = vmatmul.msk.bf16.vlgmr.msrb.gmra.mxu2 %vm469_vm0, %v72_v62 }
  0x35   :  { %638 = vmatpush.bf16.msrb.mxu3 %v996_v11 }
  0x36   :  { %530 = vmatpush.bf16.msrb.mxu0 %v978_v60 }
  0x37   :  { %543 = vmatpush.bf16.msrb.mxu1 %v986_v61 }
  0x39   :  { %639 = vmatpush.bf16.msrb.mxu3 %v995_v12 }
  0x3a   :  { %531 = vmatpush.bf16.msrb.mxu0 %v977_v63 }
  0x3b   :  { %544 = vmatpush.bf16.msrb.mxu1 %v985_v0 }
  0x3d   :  { %640 = vmatpush.bf16.msrb.mxu3 %v994_v13 }
  0x3e   :  { %532 = vmatpush.bf16.msrb.mxu0 %v976_v1 }
  0x3f   :  { %545 = vmatpush.bf16.msrb.mxu1 %v984_v2 }
  0x41   :  { %533 = vmatmul.bf16.vlgmr.msrb.gmra.mxu0 %v70_v5  ;;  %641 = vmatpush.bf16.msrb.mxu3 %v993_v16 }
  0x42   :  { %546 = vmatmul.bf16.vlgmr.msrb.gmra.mxu1 %v71_v6 }
  0x9e   :  { %v482_v14 = vpop.f32.mrf.mxu0 }
  0x9f   :  { %v495_v15 = vpop.f32.mrf.mxu1  ;;  %v483_v22 = vadd.f32 %v1001_v21, %v482_v14 }
  0xa1   :  { %v496_v25 = vadd.f32 %v495_v15, %v483_v22 }
  0xa6   :  { %v484_v17 = vpop.f32.mrf.mxu0  ;;  %v508_v19 = vpop.f32.mrf.mxu2 }
  0xa7   :  { %v497_v18 = vpop.f32.mrf.mxu1  ;;  %v521_v20 = vpop.f32.mrf.mxu3  ;;  %v509_v26 = vadd.f32 %v508_v19, %v496_v25 }
  0xa9   :  { %v522_v28 = vadd.f32 %v521_v20, %v509_v26 }
  0xae   :  { %v510_v23 = vpop.f32.mrf.mxu2 }
  0xaf   :  { %v523_v24 = vpop.f32.mrf.mxu3 }
  0xb6   :  { %v560_v27 = vpop.f32.mrf.mxu2 }
  0xbe   :  { %v534_v29 = vpop.f32.mrf.mxu0  ;;  %v562_v33 = vpop.f32.mrf.mxu2 }
  0xbf   :  { %v547_v30 = vpop.f32.mrf.mxu1  ;;  %v535_v31 = vadd.f32 %v534_v29, %v522_v28 }
  0xc1   :  { %v548_v32 = vadd.f32 %v547_v30, %v535_v31 }
  0xc3   :  { %v561_v34 = vadd.f32 %v560_v27, %v548_v32 }
  0xc5   :  { %v564_v35 = vmax.f32 %v561_v34, 0.0 }
  0xc6   :  { %v536_v36 = vpop.f32.mrf.mxu0 }
  0xc7   :  { %v549_v37 = vpop.f32.mrf.mxu1  ;;  %v565_v38 = vpack.c.bf16 %v564_v35, %v564_v35 }
  0xc9   :  { %642 = vmatmul.bf16.vlgmr.msrb.gmra.mxu3 %v565_v38 }
 0x14c   :  { %v643_v40 = vpop.f32.mrf.mxu3 }
 0x14d   :  { %v644_v41 = vadd.f32 %v1002_v39, %v643_v40 }
 0x14f   :  { %v647_v42 = vpack.c.bf16 %v644_v41, %v644_v41 }
 0x151   :  { %v649_v43 = vrot.slane %v647_v42, 3 }
 0x153   :  { %v653_v44 = vsel %vm650_vm1, %v647_v42, %v649_v43 }
 0x154   :  { %670 = vst [vmem:[#allocation2] sm:$0x1] %v653_v44  ;;  %v645_v45 = vpop.f32.mrf.mxu3 }
 0x15b   :  { %v692_v46 = vld [vmem:[#allocation2] sm:$0x1] }
 0x15c   :  { %693 = vst [vmem:[%s1242_s5] sm:$0x1] %v692_v46 }

</bundles_post_ra>
